<compile_context>
chip_gen: v7x
topology: tpu7x:2x2x1
jax: 0.10.0
libtpu: 0.0.40
codegen_flags: <defaults>
</compile_context>

<pallas_src>
import functools

import jax
import jax.numpy as jnp
from jax.experimental import pallas as pl
from jax.experimental.pallas import tpu as pltpu


def gru_decoder_kernel(ints_ref, params_ref, out_ref, *, T, Bp, D):
    """Whole GRU decoder forward in one invocation (time loop unrolled in-body)."""
    TB = T * Bp
    VP = params_ref.shape[1]                       # lane-padded width (128)

    # ---- unpack the packed parameter slab (static row offsets) ---------------
    r_whh, r_wout, r_bias, r_preh = VP, VP + D, VP + 2 * D, VP + 2 * D + 8

    w_in   = params_ref[pl.ds(0, VP), :]           # (VP, VP) one-hot -> fused gate proj
    whh    = params_ref[pl.ds(r_whh, D), :]        # (D, VP)  [Whr | Whz | Whn | 0]
    w_out  = params_ref[pl.ds(r_wout, D), :]       # (D, VP)  [W_linear | 0]
    biases = params_ref[pl.ds(r_bias, 8), :]       # (8, VP)
    h0_blk = params_ref[pl.ds(r_preh, Bp), :]      # (Bp, VP)

    b_in  = biases[0:1, :]                         # (1, VP) b_ih (+ b_hh folded for r,z)
    bhh_n = biases[1:2, 0:D]                       # (1, D)  hidden bias of the n gate
    b_out = biases[2:3, :]                         # (1, VP) output bias
    h     = h0_blk[:, 0:D]                         # (Bp, D) running hidden state

    words = ints_ref[pl.ds(0, TB), :]              # (TB, 1) int32, row = t*Bp + b
    lens  = ints_ref[pl.ds(TB, TB), :]             # (TB, 1) int32, length of batch row b

    # ---- embedding gather + input projection fused into ONE matmul -----------
    # one_hot(words) @ (emb @ W_ih) selects row `word` of the precomputed product,
    # which equals emb[word] @ W_ih exactly.
    lane_id = jax.lax.broadcasted_iota(jnp.int32, (TB, VP), 1)
    one_hot = jnp.where(lane_id == words, 1.0, 0.0)
    gi = jnp.dot(one_hot, w_in, preferred_element_type=jnp.float32) + b_in   # (TB, VP)
    gi_r, gi_z, gi_n = gi[:, 0:D], gi[:, D:2 * D], gi[:, 2 * D:3 * D]

    # hoisted broadcasts (avoid re-emitting broadcast_in_dim inside the unrolled loop)
    lens_b  = jnp.broadcast_to(lens[0:Bp, :], (Bp, D))     # (Bp, D) int32
    bhh_n_b = jnp.broadcast_to(bhh_n, (Bp, D))             # (Bp, D) f32

    # ---- serial recurrence: ONE fused (Bp,D)@(D,VP) matmul per step ----------
    hs = []
    for t in range(T):                             # static unroll, T is tiny
        lo = t * Bp
        gh = jnp.dot(h, whh, preferred_element_type=jnp.float32)     # (Bp, VP)
        r = jax.nn.sigmoid(gi_r[lo:lo + Bp, :] + gh[:, 0:D])
        z = jax.nn.sigmoid(gi_z[lo:lo + Bp, :] + gh[:, D:2 * D])
        n = jnp.tanh(gi_n[lo:lo + Bp, :] + r * (gh[:, 2 * D:3 * D] + bhh_n_b))
        h_new = n + z * (h - n)                    # == (1-z)*n + z*h
        hs.append(h_new)
        h = jnp.where(t < lens_b, h_new, h)        # freeze hidden past sequence end

    # ---- pad_packed masking applied once to the register-resident stack ------
    h_all = jnp.concatenate(hs, axis=0)                               # (TB, D), in vregs
    row_id = jax.lax.broadcasted_iota(jnp.int32, (TB, D), 0)
    valid = row_id < jnp.broadcast_to(lens, (TB, D)) * Bp             # row t*Bp+b valid iff t < len[b]
    h_all = jnp.where(valid, h_all, 0.0)

    # ---- hoisted, lane-dense output projection: one matmul, one full store ---
    out_ref[...] = (jnp.dot(h_all, w_out, preferred_element_type=jnp.float32)
                    + b_out).astype(out_ref.dtype)


@jax.jit
def decoder_forward(words, lengths, pre_h, params):
    """JAX wrapper: pack operands, call the single-shot Pallas kernel, unpack output."""
    emb = params["embedding"]                        # (V, D)
    w_ih, w_hh = params["w_ih"], params["w_hh"]      # (D, 3D) = PyTorch W^T, gates (r,z,n)
    b_ih, b_hh = params["b_ih"], params["b_hh"]      # (1, 3D)
    w_out, b_out = params["w_out"], params["b_out"]  # (D, V), (1, V)

    B, T = words.shape
    D = emb.shape[1]
    V = w_out.shape[1]
    VP = 128                                         # lane width of every packed operand
    Bp = ((B + 7) // 8) * 8                          # batch padded to the 8-sublane granule
    assert 3 * D <= VP and V <= VP and emb.shape[0] <= VP

    hi = jax.lax.Precision.HIGHEST

    # ---- int operand: time-major word ids + per-row lengths ------------------
    words_p = jnp.zeros((Bp, T), jnp.int32).at[:B, :].set(words.astype(jnp.int32))
    words_tm = jnp.transpose(words_p, (1, 0)).reshape(T * Bp, 1)     # row = t*Bp + b
    lens_p = jnp.zeros((Bp,), jnp.int32).at[:B].set(lengths.astype(jnp.int32))
    lens_tm = jnp.broadcast_to(lens_p[None, :], (T, Bp)).reshape(T * Bp, 1)
    ints = jnp.concatenate([words_tm, lens_tm], axis=0)              # (2*T*Bp, 1) int32

    # ---- f32 parameter slab, everything lane-padded to 128 -------------------
    # Embedding folded into the input projection; b_hh_{r,z} folded into b_ih_{r,z}.
    w_in = jnp.zeros((VP, VP), jnp.float32).at[:emb.shape[0], :3 * D].set(
        jnp.dot(emb, w_ih, precision=hi))
    whh = jnp.zeros((D, VP), jnp.float32).at[:, :3 * D].set(w_hh)
    w_out_p = jnp.zeros((D, VP), jnp.float32).at[:, :V].set(w_out)
    biases = jnp.zeros((8, VP), jnp.float32)
    biases = biases.at[0, :2 * D].set(b_ih[0, :2 * D] + b_hh[0, :2 * D])
    biases = biases.at[0, 2 * D:3 * D].set(b_ih[0, 2 * D:])
    biases = biases.at[1, :D].set(b_hh[0, 2 * D:])
    biases = biases.at[2, :V].set(b_out[0])
    pre_h_p = jnp.zeros((Bp, VP), jnp.float32).at[:B, :D].set(pre_h)
    params_slab = jnp.concatenate([w_in, whh, w_out_p, biases, pre_h_p], axis=0)

    vmem = pl.BlockSpec(memory_space=pltpu.MemorySpace.VMEM)
    out_flat = pl.pallas_call(
        functools.partial(gru_decoder_kernel, T=T, Bp=Bp, D=D),
        out_shape=jax.ShapeDtypeStruct((T * Bp, VP), jnp.float32),
        in_specs=[vmem, vmem],
        out_specs=vmem,
    )(ints, params_slab)

    # pad_packed_sequence trims the time axis to max(lengths); return the full
    # (B, T, V) so the wrapper stays jit-friendly — caller applies the static trim.
    out = out_flat.reshape(T, Bp, VP).transpose(1, 0, 2)[:B, :, :V]  # (B, T, V)
    return out


def decoder_forward_ref(words, lengths, pre_h, params):
    """Pure-JAX reference (lax.scan) for correctness checking."""
    emb = params["embedding"]
    w_ih, w_hh = params["w_ih"], params["w_hh"]
    b_ih, b_hh = params["b_ih"][0], params["b_hh"][0]
    w_out, b_out = params["w_out"], params["b_out"][0]
    B, T = words.shape
    D = emb.shape[1]

    x = jnp.transpose(jnp.take(emb, words, axis=0), (1, 0, 2))   # (T, B, D)
    mask = (jnp.arange(T)[:, None] < lengths[None, :]).astype(jnp.float32)[..., None]

    def step(h, inp):
        x_t, m_t = inp
        gi = x_t @ w_ih + b_ih
        gh = h @ w_hh + b_hh
        r = jax.nn.sigmoid(gi[:, :D] + gh[:, :D])
        z = jax.nn.sigmoid(gi[:, D:2 * D] + gh[:, D:2 * D])
        n = jnp.tanh(gi[:, 2 * D:] + r * gh[:, 2 * D:])
        h_new = (1.0 - z) * n + z * h
        out_t = h_new * m_t
        h_next = h + m_t * (h_new - h)
        return h_next, out_t

    _, outs = jax.lax.scan(step, pre_h, (x, mask))               # (T, B, D)
    logits = jnp.einsum("tbd,dv->tbv", outs, w_out) + b_out
    return jnp.transpose(logits, (1, 0, 2))                      # (B, T, V)


if __name__ == "__main__":
    key = jax.random.PRNGKey(0)
    B, T = 2, 8                 # batch, sequence length
    D = 32                      # self.dim = args.dim * 2 (args.dim=16, bidir=True)
    V = 28                      # dict_size

    ks = jax.random.split(key, 10)
    params = {
        "embedding": jax.random.normal(ks[0], (V, D), jnp.float32) * 0.1,
        "w_ih":      jax.random.normal(ks[1], (D, 3 * D), jnp.float32) * 0.1,  # W_ih^T
        "w_hh":      jax.random.normal(ks[2], (D, 3 * D), jnp.float32) * 0.1,  # W_hh^T
        "b_ih":      jax.random.normal(ks[3], (1, 3 * D), jnp.float32) * 0.1,
        "b_hh":      jax.random.normal(ks[4], (1, 3 * D), jnp.float32) * 0.1,
        "w_out":     jax.random.normal(ks[5], (D, V), jnp.float32) * 0.1,      # linear W^T
        "b_out":     jax.random.normal(ks[6], (1, V), jnp.float32) * 0.1,
    }

    words = jax.random.randint(ks[7], (B, T), 0, V, dtype=jnp.int32)
    lengths_list = [T, T - 3]
    lengths = jnp.array(lengths_list, dtype=jnp.int32)
    pre_h = jax.random.normal(ks[8], (B, D), jnp.float32) * 0.1

    out = decoder_forward(words, lengths, pre_h, params)
    out = jax.block_until_ready(out)

    ref = decoder_forward_ref(words, lengths, pre_h, params)

    # pad_packed_sequence trims to max(lengths); apply the (static) trim here.
    t_max = max(lengths_list)
    assert out.shape == (B, T, V)
    assert jnp.allclose(out[:, :t_max], ref[:, :t_max], atol=1e-4, rtol=1e-4), \
        "Pallas kernel mismatch vs reference"

    # TODO(synk): the `serial` greedy-decode method (data-dependent loop with topk/EOS
    # early exit and teacher forcing) is host-control-flow driven and not part of
    # forward(); not ported.
    print("KERNEL_OK")
</pallas_src>

<mosaic_0001>
module attributes {stable_mosaic.version = 11 : i64} {
  func.func @gru_decoder_kernel(%arg0: memref<128x1xi32, #tpu.memory_space<vmem>>, %arg1: memref<208x128xf32, #tpu.memory_space<vmem>>, %arg2: memref<64x128xf32, #tpu.memory_space<vmem>>) attributes {dimension_semantics = [], scalar_prefetch = 0 : i64, scratch_operands = 0 : i64, tpu.core_type = #tpu.core_type<tc>} {
    %c0 = arith.constant 0 : index
    %c0_0 = arith.constant 0 : index
    %0 = vector.load %arg1[%c0, %c0_0] : memref<208x128xf32, #tpu.memory_space<vmem>>, vector<128x128xf32>
    %c128 = arith.constant 128 : index
    %c0_1 = arith.constant 0 : index
    %1 = vector.load %arg1[%c128, %c0_1] : memref<208x128xf32, #tpu.memory_space<vmem>>, vector<32x128xf32>
    %c160 = arith.constant 160 : index
    %c0_2 = arith.constant 0 : index
    %2 = vector.load %arg1[%c160, %c0_2] : memref<208x128xf32, #tpu.memory_space<vmem>>, vector<32x128xf32>
    %c192 = arith.constant 192 : index
    %c0_3 = arith.constant 0 : index
    %3 = vector.load %arg1[%c192, %c0_3] : memref<208x128xf32, #tpu.memory_space<vmem>>, vector<8x128xf32>
    %c200 = arith.constant 200 : index
    %c0_4 = arith.constant 0 : index
    %4 = vector.load %arg1[%c200, %c0_4] : memref<208x128xf32, #tpu.memory_space<vmem>>, vector<8x128xf32>
    %5 = vector.extract_strided_slice %3 {offsets = [0, 0], sizes = [1, 128], strides = [1, 1]} : vector<8x128xf32> to vector<1x128xf32>
    %6 = vector.extract_strided_slice %3 {offsets = [1, 0], sizes = [1, 32], strides = [1, 1]} : vector<8x128xf32> to vector<1x32xf32>
    %7 = vector.extract_strided_slice %3 {offsets = [2, 0], sizes = [1, 128], strides = [1, 1]} : vector<8x128xf32> to vector<1x128xf32>
    %8 = vector.extract_strided_slice %4 {offsets = [0, 0], sizes = [8, 32], strides = [1, 1]} : vector<8x128xf32> to vector<8x32xf32>
    %c0_5 = arith.constant 0 : index
    %c0_6 = arith.constant 0 : index
    %9 = vector.load %arg0[%c0_5, %c0_6] : memref<128x1xi32, #tpu.memory_space<vmem>>, vector<64x1xi32>
    %c64 = arith.constant 64 : index
    %c0_7 = arith.constant 0 : index
    %10 = vector.load %arg0[%c64, %c0_7] : memref<128x1xi32, #tpu.memory_space<vmem>>, vector<64x1xi32>
    %11 = tpu.iota {dimensions = array<i32: 1>} : vector<64x128xi32>
    %12 = vector.broadcast %9 : vector<64x1xi32> to vector<64x128xi32>
    %13 = arith.cmpi eq, %11, %12 : vector<64x128xi32>
    %cst = arith.constant 1.000000e+00 : f32
    %cst_8 = arith.constant 0.000000e+00 : f32
    %14 = vector.broadcast %cst : f32 to vector<64x128xf32>
    %15 = vector.broadcast %cst_8 : f32 to vector<64x128xf32>
    %16 = arith.select %13, %14, %15 : vector<64x128xi1>, vector<64x128xf32>
    %cst_9 = arith.constant dense<0.000000e+00> : vector<64x128xf32>
    %17 = tpu.matmul %16, %0, %cst_9 {dimension_numbers = #tpu.dot_dimension_numbers<[1], [0], [0], [1], [0, 0, 1, 1], [], []>} : vector<64x128xf32>, vector<128x128xf32>, vector<64x128xf32> -> vector<64x128xf32>
    %18 = vector.broadcast %5 : vector<1x128xf32> to vector<64x128xf32>
    %19 = arith.addf %17, %18 : vector<64x128xf32>
    %20 = vector.extract_strided_slice %19 {offsets = [0, 0], sizes = [64, 32], strides = [1, 1]} : vector<64x128xf32> to vector<64x32xf32>
    %21 = vector.extract_strided_slice %19 {offsets = [0, 32], sizes = [64, 32], strides = [1, 1]} : vector<64x128xf32> to vector<64x32xf32>
    %22 = vector.extract_strided_slice %19 {offsets = [0, 64], sizes = [64, 32], strides = [1, 1]} : vector<64x128xf32> to vector<64x32xf32>
    %23 = vector.extract_strided_slice %10 {offsets = [0, 0], sizes = [8, 1], strides = [1, 1]} : vector<64x1xi32> to vector<8x1xi32>
    %24 = vector.shape_cast %23 : vector<8x1xi32> to vector<8x1xi32>
    %25 = vector.broadcast %24 : vector<8x1xi32> to vector<8x32xi32>
    %26 = vector.shape_cast %6 : vector<1x32xf32> to vector<1x32xf32>
    %27 = vector.broadcast %26 : vector<1x32xf32> to vector<8x32xf32>
    %cst_10 = arith.constant dense<0.000000e+00> : vector<8x128xf32>
    %28 = tpu.matmul %8, %1, %cst_10 {dimension_numbers = #tpu.dot_dimension_numbers<[1], [0], [0], [1], [0, 0, 1, 1], [], []>} : vector<8x32xf32>, vector<32x128xf32>, vector<8x128xf32> -> vector<8x128xf32>
    %29 = vector.extract_strided_slice %20 {offsets = [0, 0], sizes = [8, 32], strides = [1, 1]} : vector<64x32xf32> to vector<8x32xf32>
    %30 = vector.extract_strided_slice %28 {offsets = [0, 0], sizes = [8, 32], strides = [1, 1]} : vector<8x128xf32> to vector<8x32xf32>
    %31 = arith.addf %29, %30 : vector<8x32xf32>
    %32 = arith.negf %31 : vector<8x32xf32>
    %33 = math.exp %32 : vector<8x32xf32>
    %cst_11 = arith.constant 1.000000e+00 : f32
    %34 = vector.broadcast %cst_11 : f32 to vector<8x32xf32>
    %35 = arith.addf %34, %33 : vector<8x32xf32>
    %36 = arith.divf %34, %35 : vector<8x32xf32>
    %37 = vector.extract_strided_slice %21 {offsets = [0, 0], sizes = [8, 32], strides = [1, 1]} : vector<64x32xf32> to vector<8x32xf32>
    %38 = vector.extract_strided_slice %28 {offsets = [0, 32], sizes = [8, 32], strides = [1, 1]} : vector<8x128xf32> to vector<8x32xf32>
    %39 = arith.addf %37, %38 : vector<8x32xf32>
    %40 = arith.negf %39 : vector<8x32xf32>
    %41 = math.exp %40 : vector<8x32xf32>
    %cst_12 = arith.constant 1.000000e+00 : f32
    %42 = vector.broadcast %cst_12 : f32 to vector<8x32xf32>
    %43 = arith.addf %42, %41 : vector<8x32xf32>
    %44 = arith.divf %42, %43 : vector<8x32xf32>
    %45 = vector.extract_strided_slice %22 {offsets = [0, 0], sizes = [8, 32], strides = [1, 1]} : vector<64x32xf32> to vector<8x32xf32>
    %46 = vector.extract_strided_slice %28 {offsets = [0, 64], sizes = [8, 32], strides = [1, 1]} : vector<8x128xf32> to vector<8x32xf32>
    %47 = arith.addf %46, %27 : vector<8x32xf32>
    %48 = arith.mulf %36, %47 : vector<8x32xf32>
    %49 = arith.addf %45, %48 : vector<8x32xf32>
    %50 = math.tanh %49 : vector<8x32xf32>
    %51 = arith.subf %8, %50 : vector<8x32xf32>
    %52 = arith.mulf %44, %51 : vector<8x32xf32>
    %53 = arith.addf %50, %52 : vector<8x32xf32>
    %c0_i32 = arith.constant 0 : i32
    %54 = vector.broadcast %c0_i32 : i32 to vector<8x32xi32>
    %55 = arith.cmpi sgt, %25, %54 : vector<8x32xi32>
    %56 = arith.select %55, %53, %8 : vector<8x32xi1>, vector<8x32xf32>
    %cst_13 = arith.constant dense<0.000000e+00> : vector<8x128xf32>
    %57 = tpu.matmul %56, %1, %cst_13 {dimension_numbers = #tpu.dot_dimension_numbers<[1], [0], [0], [1], [0, 0, 1, 1], [], []>} : vector<8x32xf32>, vector<32x128xf32>, vector<8x128xf32> -> vector<8x128xf32>
    %58 = vector.extract_strided_slice %20 {offsets = [8, 0], sizes = [8, 32], strides = [1, 1]} : vector<64x32xf32> to vector<8x32xf32>
    %59 = vector.extract_strided_slice %57 {offsets = [0, 0], sizes = [8, 32], strides = [1, 1]} : vector<8x128xf32> to vector<8x32xf32>
    %60 = arith.addf %58, %59 : vector<8x32xf32>
    %61 = arith.negf %60 : vector<8x32xf32>
    %62 = math.exp %61 : vector<8x32xf32>
    %cst_14 = arith.constant 1.000000e+00 : f32
    %63 = vector.broadcast %cst_14 : f32 to vector<8x32xf32>
    %64 = arith.addf %63, %62 : vector<8x32xf32>
    %65 = arith.divf %63, %64 : vector<8x32xf32>
    %66 = vector.extract_strided_slice %21 {offsets = [8, 0], sizes = [8, 32], strides = [1, 1]} : vector<64x32xf32> to vector<8x32xf32>
    %67 = vector.extract_strided_slice %57 {offsets = [0, 32], sizes = [8, 32], strides = [1, 1]} : vector<8x128xf32> to vector<8x32xf32>
    %68 = arith.addf %66, %67 : vector<8x32xf32>
    %69 = arith.negf %68 : vector<8x32xf32>
    %70 = math.exp %69 : vector<8x32xf32>
    %cst_15 = arith.constant 1.000000e+00 : f32
    %71 = vector.broadcast %cst_15 : f32 to vector<8x32xf32>
    %72 = arith.addf %71, %70 : vector<8x32xf32>
    %73 = arith.divf %71, %72 : vector<8x32xf32>
    %74 = vector.extract_strided_slice %22 {offsets = [8, 0], sizes = [8, 32], strides = [1, 1]} : vector<64x32xf32> to vector<8x32xf32>
    %75 = vector.extract_strided_slice %57 {offsets = [0, 64], sizes = [8, 32], strides = [1, 1]} : vector<8x128xf32> to vector<8x32xf32>
    %76 = arith.addf %75, %27 : vector<8x32xf32>
    %77 = arith.mulf %65, %76 : vector<8x32xf32>
    %78 = arith.addf %74, %77 : vector<8x32xf32>
    %79 = math.tanh %78 : vector<8x32xf32>
    %80 = arith.subf %56, %79 : vector<8x32xf32>
    %81 = arith.mulf %73, %80 : vector<8x32xf32>
    %82 = arith.addf %79, %81 : vector<8x32xf32>
    %c1_i32 = arith.constant 1 : i32
    %83 = vector.broadcast %c1_i32 : i32 to vector<8x32xi32>
    %84 = arith.cmpi sgt, %25, %83 : vector<8x32xi32>
    %85 = arith.select %84, %82, %56 : vector<8x32xi1>, vector<8x32xf32>
    %cst_16 = arith.constant dense<0.000000e+00> : vector<8x128xf32>
    %86 = tpu.matmul %85, %1, %cst_16 {dimension_numbers = #tpu.dot_dimension_numbers<[1], [0], [0], [1], [0, 0, 1, 1], [], []>} : vector<8x32xf32>, vector<32x128xf32>, vector<8x128xf32> -> vector<8x128xf32>
    %87 = vector.extract_strided_slice %20 {offsets = [16, 0], sizes = [8, 32], strides = [1, 1]} : vector<64x32xf32> to vector<8x32xf32>
    %88 = vector.extract_strided_slice %86 {offsets = [0, 0], sizes = [8, 32], strides = [1, 1]} : vector<8x128xf32> to vector<8x32xf32>
    %89 = arith.addf %87, %88 : vector<8x32xf32>
    %90 = arith.negf %89 : vector<8x32xf32>
    %91 = math.exp %90 : vector<8x32xf32>
    %cst_17 = arith.constant 1.000000e+00 : f32
    %92 = vector.broadcast %cst_17 : f32 to vector<8x32xf32>
    %93 = arith.addf %92, %91 : vector<8x32xf32>
    %94 = arith.divf %92, %93 : vector<8x32xf32>
    %95 = vector.extract_strided_slice %21 {offsets = [16, 0], sizes = [8, 32], strides = [1, 1]} : vector<64x32xf32> to vector<8x32xf32>
    %96 = vector.extract_strided_slice %86 {offsets = [0, 32], sizes = [8, 32], strides = [1, 1]} : vector<8x128xf32> to vector<8x32xf32>
    %97 = arith.addf %95, %96 : vector<8x32xf32>
    %98 = arith.negf %97 : vector<8x32xf32>
    %99 = math.exp %98 : vector<8x32xf32>
    %cst_18 = arith.constant 1.000000e+00 : f32
    %100 = vector.broadcast %cst_18 : f32 to vector<8x32xf32>
    %101 = arith.addf %100, %99 : vector<8x32xf32>
    %102 = arith.divf %100, %101 : vector<8x32xf32>
    %103 = vector.extract_strided_slice %22 {offsets = [16, 0], sizes = [8, 32], strides = [1, 1]} : vector<64x32xf32> to vector<8x32xf32>
    %104 = vector.extract_strided_slice %86 {offsets = [0, 64], sizes = [8, 32], strides = [1, 1]} : vector<8x128xf32> to vector<8x32xf32>
    %105 = arith.addf %104, %27 : vector<8x32xf32>
    %106 = arith.mulf %94, %105 : vector<8x32xf32>
    %107 = arith.addf %103, %106 : vector<8x32xf32>
    %108 = math.tanh %107 : vector<8x32xf32>
    %109 = arith.subf %85, %108 : vector<8x32xf32>
    %110 = arith.mulf %102, %109 : vector<8x32xf32>
    %111 = arith.addf %108, %110 : vector<8x32xf32>
    %c2_i32 = arith.constant 2 : i32
    %112 = vector.broadcast %c2_i32 : i32 to vector<8x32xi32>
    %113 = arith.cmpi sgt, %25, %112 : vector<8x32xi32>
    %114 = arith.select %113, %111, %85 : vector<8x32xi1>, vector<8x32xf32>
    %cst_19 = arith.constant dense<0.000000e+00> : vector<8x128xf32>
    %115 = tpu.matmul %114, %1, %cst_19 {dimension_numbers = #tpu.dot_dimension_numbers<[1], [0], [0], [1], [0, 0, 1, 1], [], []>} : vector<8x32xf32>, vector<32x128xf32>, vector<8x128xf32> -> vector<8x128xf32>
    %116 = vector.extract_strided_slice %20 {offsets = [24, 0], sizes = [8, 32], strides = [1, 1]} : vector<64x32xf32> to vector<8x32xf32>
    %117 = vector.extract_strided_slice %115 {offsets = [0, 0], sizes = [8, 32], strides = [1, 1]} : vector<8x128xf32> to vector<8x32xf32>
    %118 = arith.addf %116, %117 : vector<8x32xf32>
    %119 = arith.negf %118 : vector<8x32xf32>
    %120 = math.exp %119 : vector<8x32xf32>
    %cst_20 = arith.constant 1.000000e+00 : f32
    %121 = vector.broadcast %cst_20 : f32 to vector<8x32xf32>
    %122 = arith.addf %121, %120 : vector<8x32xf32>
    %123 = arith.divf %121, %122 : vector<8x32xf32>
    %124 = vector.extract_strided_slice %21 {offsets = [24, 0], sizes = [8, 32], strides = [1, 1]} : vector<64x32xf32> to vector<8x32xf32>
    %125 = vector.extract_strided_slice %115 {offsets = [0, 32], sizes = [8, 32], strides = [1, 1]} : vector<8x128xf32> to vector<8x32xf32>
    %126 = arith.addf %124, %125 : vector<8x32xf32>
    %127 = arith.negf %126 : vector<8x32xf32>
    %128 = math.exp %127 : vector<8x32xf32>
    %cst_21 = arith.constant 1.000000e+00 : f32
    %129 = vector.broadcast %cst_21 : f32 to vector<8x32xf32>
    %130 = arith.addf %129, %128 : vector<8x32xf32>
    %131 = arith.divf %129, %130 : vector<8x32xf32>
    %132 = vector.extract_strided_slice %22 {offsets = [24, 0], sizes = [8, 32], strides = [1, 1]} : vector<64x32xf32> to vector<8x32xf32>
    %133 = vector.extract_strided_slice %115 {offsets = [0, 64], sizes = [8, 32], strides = [1, 1]} : vector<8x128xf32> to vector<8x32xf32>
    %134 = arith.addf %133, %27 : vector<8x32xf32>
    %135 = arith.mulf %123, %134 : vector<8x32xf32>
    %136 = arith.addf %132, %135 : vector<8x32xf32>
    %137 = math.tanh %136 : vector<8x32xf32>
    %138 = arith.subf %114, %137 : vector<8x32xf32>
    %139 = arith.mulf %131, %138 : vector<8x32xf32>
    %140 = arith.addf %137, %139 : vector<8x32xf32>
    %c3_i32 = arith.constant 3 : i32
    %141 = vector.broadcast %c3_i32 : i32 to vector<8x32xi32>
    %142 = arith.cmpi sgt, %25, %141 : vector<8x32xi32>
    %143 = arith.select %142, %140, %114 : vector<8x32xi1>, vector<8x32xf32>
    %cst_22 = arith.constant dense<0.000000e+00> : vector<8x128xf32>
    %144 = tpu.matmul %143, %1, %cst_22 {dimension_numbers = #tpu.dot_dimension_numbers<[1], [0], [0], [1], [0, 0, 1, 1], [], []>} : vector<8x32xf32>, vector<32x128xf32>, vector<8x128xf32> -> vector<8x128xf32>
    %145 = vector.extract_strided_slice %20 {offsets = [32, 0], sizes = [8, 32], strides = [1, 1]} : vector<64x32xf32> to vector<8x32xf32>
    %146 = vector.extract_strided_slice %144 {offsets = [0, 0], sizes = [8, 32], strides = [1, 1]} : vector<8x128xf32> to vector<8x32xf32>
    %147 = arith.addf %145, %146 : vector<8x32xf32>
    %148 = arith.negf %147 : vector<8x32xf32>
    %149 = math.exp %148 : vector<8x32xf32>
    %cst_23 = arith.constant 1.000000e+00 : f32
    %150 = vector.broadcast %cst_23 : f32 to vector<8x32xf32>
    %151 = arith.addf %150, %149 : vector<8x32xf32>
    %152 = arith.divf %150, %151 : vector<8x32xf32>
    %153 = vector.extract_strided_slice %21 {offsets = [32, 0], sizes = [8, 32], strides = [1, 1]} : vector<64x32xf32> to vector<8x32xf32>
    %154 = vector.extract_strided_slice %144 {offsets = [0, 32], sizes = [8, 32], strides = [1, 1]} : vector<8x128xf32> to vector<8x32xf32>
    %155 = arith.addf %153, %154 : vector<8x32xf32>
    %156 = arith.negf %155 : vector<8x32xf32>
    %157 = math.exp %156 : vector<8x32xf32>
    %cst_24 = arith.constant 1.000000e+00 : f32
    %158 = vector.broadcast %cst_24 : f32 to vector<8x32xf32>
    %159 = arith.addf %158, %157 : vector<8x32xf32>
    %160 = arith.divf %158, %159 : vector<8x32xf32>
    %161 = vector.extract_strided_slice %22 {offsets = [32, 0], sizes = [8, 32], strides = [1, 1]} : vector<64x32xf32> to vector<8x32xf32>
    %162 = vector.extract_strided_slice %144 {offsets = [0, 64], sizes = [8, 32], strides = [1, 1]} : vector<8x128xf32> to vector<8x32xf32>
    %163 = arith.addf %162, %27 : vector<8x32xf32>
    %164 = arith.mulf %152, %163 : vector<8x32xf32>
    %165 = arith.addf %161, %164 : vector<8x32xf32>
    %166 = math.tanh %165 : vector<8x32xf32>
    %167 = arith.subf %143, %166 : vector<8x32xf32>
    %168 = arith.mulf %160, %167 : vector<8x32xf32>
    %169 = arith.addf %166, %168 : vector<8x32xf32>
    %c4_i32 = arith.constant 4 : i32
    %170 = vector.broadcast %c4_i32 : i32 to vector<8x32xi32>
    %171 = arith.cmpi sgt, %25, %170 : vector<8x32xi32>
    %172 = arith.select %171, %169, %143 : vector<8x32xi1>, vector<8x32xf32>
    %cst_25 = arith.constant dense<0.000000e+00> : vector<8x128xf32>
    %173 = tpu.matmul %172, %1, %cst_25 {dimension_numbers = #tpu.dot_dimension_numbers<[1], [0], [0], [1], [0, 0, 1, 1], [], []>} : vector<8x32xf32>, vector<32x128xf32>, vector<8x128xf32> -> vector<8x128xf32>
    %174 = vector.extract_strided_slice %20 {offsets = [40, 0], sizes = [8, 32], strides = [1, 1]} : vector<64x32xf32> to vector<8x32xf32>
    %175 = vector.extract_strided_slice %173 {offsets = [0, 0], sizes = [8, 32], strides = [1, 1]} : vector<8x128xf32> to vector<8x32xf32>
    %176 = arith.addf %174, %175 : vector<8x32xf32>
    %177 = arith.negf %176 : vector<8x32xf32>
    %178 = math.exp %177 : vector<8x32xf32>
    %cst_26 = arith.constant 1.000000e+00 : f32
    %179 = vector.broadcast %cst_26 : f32 to vector<8x32xf32>
    %180 = arith.addf %179, %178 : vector<8x32xf32>
    %181 = arith.divf %179, %180 : vector<8x32xf32>
    %182 = vector.extract_strided_slice %21 {offsets = [40, 0], sizes = [8, 32], strides = [1, 1]} : vector<64x32xf32> to vector<8x32xf32>
    %183 = vector.extract_strided_slice %173 {offsets = [0, 32], sizes = [8, 32], strides = [1, 1]} : vector<8x128xf32> to vector<8x32xf32>
    %184 = arith.addf %182, %183 : vector<8x32xf32>
    %185 = arith.negf %184 : vector<8x32xf32>
    %186 = math.exp %185 : vector<8x32xf32>
    %cst_27 = arith.constant 1.000000e+00 : f32
    %187 = vector.broadcast %cst_27 : f32 to vector<8x32xf32>
    %188 = arith.addf %187, %186 : vector<8x32xf32>
    %189 = arith.divf %187, %188 : vector<8x32xf32>
    %190 = vector.extract_strided_slice %22 {offsets = [40, 0], sizes = [8, 32], strides = [1, 1]} : vector<64x32xf32> to vector<8x32xf32>
    %191 = vector.extract_strided_slice %173 {offsets = [0, 64], sizes = [8, 32], strides = [1, 1]} : vector<8x128xf32> to vector<8x32xf32>
    %192 = arith.addf %191, %27 : vector<8x32xf32>
    %193 = arith.mulf %181, %192 : vector<8x32xf32>
    %194 = arith.addf %190, %193 : vector<8x32xf32>
    %195 = math.tanh %194 : vector<8x32xf32>
    %196 = arith.subf %172, %195 : vector<8x32xf32>
    %197 = arith.mulf %189, %196 : vector<8x32xf32>
    %198 = arith.addf %195, %197 : vector<8x32xf32>
    %c5_i32 = arith.constant 5 : i32
    %199 = vector.broadcast %c5_i32 : i32 to vector<8x32xi32>
    %200 = arith.cmpi sgt, %25, %199 : vector<8x32xi32>
    %201 = arith.select %200, %198, %172 : vector<8x32xi1>, vector<8x32xf32>
    %cst_28 = arith.constant dense<0.000000e+00> : vector<8x128xf32>
    %202 = tpu.matmul %201, %1, %cst_28 {dimension_numbers = #tpu.dot_dimension_numbers<[1], [0], [0], [1], [0, 0, 1, 1], [], []>} : vector<8x32xf32>, vector<32x128xf32>, vector<8x128xf32> -> vector<8x128xf32>
    %203 = vector.extract_strided_slice %20 {offsets = [48, 0], sizes = [8, 32], strides = [1, 1]} : vector<64x32xf32> to vector<8x32xf32>
    %204 = vector.extract_strided_slice %202 {offsets = [0, 0], sizes = [8, 32], strides = [1, 1]} : vector<8x128xf32> to vector<8x32xf32>
    %205 = arith.addf %203, %204 : vector<8x32xf32>
    %206 = arith.negf %205 : vector<8x32xf32>
    %207 = math.exp %206 : vector<8x32xf32>
    %cst_29 = arith.constant 1.000000e+00 : f32
    %208 = vector.broadcast %cst_29 : f32 to vector<8x32xf32>
    %209 = arith.addf %208, %207 : vector<8x32xf32>
    %210 = arith.divf %208, %209 : vector<8x32xf32>
    %211 = vector.extract_strided_slice %21 {offsets = [48, 0], sizes = [8, 32], strides = [1, 1]} : vector<64x32xf32> to vector<8x32xf32>
    %212 = vector.extract_strided_slice %202 {offsets = [0, 32], sizes = [8, 32], strides = [1, 1]} : vector<8x128xf32> to vector<8x32xf32>
    %213 = arith.addf %211, %212 : vector<8x32xf32>
    %214 = arith.negf %213 : vector<8x32xf32>
    %215 = math.exp %214 : vector<8x32xf32>
    %cst_30 = arith.constant 1.000000e+00 : f32
    %216 = vector.broadcast %cst_30 : f32 to vector<8x32xf32>
    %217 = arith.addf %216, %215 : vector<8x32xf32>
    %218 = arith.divf %216, %217 : vector<8x32xf32>
    %219 = vector.extract_strided_slice %22 {offsets = [48, 0], sizes = [8, 32], strides = [1, 1]} : vector<64x32xf32> to vector<8x32xf32>
    %220 = vector.extract_strided_slice %202 {offsets = [0, 64], sizes = [8, 32], strides = [1, 1]} : vector<8x128xf32> to vector<8x32xf32>
    %221 = arith.addf %220, %27 : vector<8x32xf32>
    %222 = arith.mulf %210, %221 : vector<8x32xf32>
    %223 = arith.addf %219, %222 : vector<8x32xf32>
    %224 = math.tanh %223 : vector<8x32xf32>
    %225 = arith.subf %201, %224 : vector<8x32xf32>
    %226 = arith.mulf %218, %225 : vector<8x32xf32>
    %227 = arith.addf %224, %226 : vector<8x32xf32>
    %c6_i32 = arith.constant 6 : i32
    %228 = vector.broadcast %c6_i32 : i32 to vector<8x32xi32>
    %229 = arith.cmpi sgt, %25, %228 : vector<8x32xi32>
    %230 = arith.select %229, %227, %201 : vector<8x32xi1>, vector<8x32xf32>
    %cst_31 = arith.constant dense<0.000000e+00> : vector<8x128xf32>
    %231 = tpu.matmul %230, %1, %cst_31 {dimension_numbers = #tpu.dot_dimension_numbers<[1], [0], [0], [1], [0, 0, 1, 1], [], []>} : vector<8x32xf32>, vector<32x128xf32>, vector<8x128xf32> -> vector<8x128xf32>
    %232 = vector.extract_strided_slice %20 {offsets = [56, 0], sizes = [8, 32], strides = [1, 1]} : vector<64x32xf32> to vector<8x32xf32>
    %233 = vector.extract_strided_slice %231 {offsets = [0, 0], sizes = [8, 32], strides = [1, 1]} : vector<8x128xf32> to vector<8x32xf32>
    %234 = arith.addf %232, %233 : vector<8x32xf32>
    %235 = arith.negf %234 : vector<8x32xf32>
    %236 = math.exp %235 : vector<8x32xf32>
    %cst_32 = arith.constant 1.000000e+00 : f32
    %237 = vector.broadcast %cst_32 : f32 to vector<8x32xf32>
    %238 = arith.addf %237, %236 : vector<8x32xf32>
    %239 = arith.divf %237, %238 : vector<8x32xf32>
    %240 = vector.extract_strided_slice %21 {offsets = [56, 0], sizes = [8, 32], strides = [1, 1]} : vector<64x32xf32> to vector<8x32xf32>
    %241 = vector.extract_strided_slice %231 {offsets = [0, 32], sizes = [8, 32], strides = [1, 1]} : vector<8x128xf32> to vector<8x32xf32>
    %242 = arith.addf %240, %241 : vector<8x32xf32>
    %243 = arith.negf %242 : vector<8x32xf32>
    %244 = math.exp %243 : vector<8x32xf32>
    %cst_33 = arith.constant 1.000000e+00 : f32
    %245 = vector.broadcast %cst_33 : f32 to vector<8x32xf32>
    %246 = arith.addf %245, %244 : vector<8x32xf32>
    %247 = arith.divf %245, %246 : vector<8x32xf32>
    %248 = vector.extract_strided_slice %22 {offsets = [56, 0], sizes = [8, 32], strides = [1, 1]} : vector<64x32xf32> to vector<8x32xf32>
    %249 = vector.extract_strided_slice %231 {offsets = [0, 64], sizes = [8, 32], strides = [1, 1]} : vector<8x128xf32> to vector<8x32xf32>
    %250 = arith.addf %249, %27 : vector<8x32xf32>
    %251 = arith.mulf %239, %250 : vector<8x32xf32>
    %252 = arith.addf %248, %251 : vector<8x32xf32>
    %253 = math.tanh %252 : vector<8x32xf32>
    %254 = arith.subf %230, %253 : vector<8x32xf32>
    %255 = arith.mulf %247, %254 : vector<8x32xf32>
    %256 = arith.addf %253, %255 : vector<8x32xf32>
    %257 = tpu.concatenate %53, %82, %111, %140, %169, %198, %227, %256 in 0 : vector<8x32xf32>, vector<8x32xf32>, vector<8x32xf32>, vector<8x32xf32>, vector<8x32xf32>, vector<8x32xf32>, vector<8x32xf32>, vector<8x32xf32> -> vector<64x32xf32>
    %258 = tpu.iota {dimensions = array<i32: 0>} : vector<64x32xi32>
    %259 = vector.shape_cast %10 : vector<64x1xi32> to vector<64x1xi32>
    %260 = vector.broadcast %259 : vector<64x1xi32> to vector<64x32xi32>
    %c8_i32 = arith.constant 8 : i32
    %261 = vector.broadcast %c8_i32 : i32 to vector<64x32xi32>
    %262 = arith.muli %260, %261 : vector<64x32xi32>
    %263 = arith.cmpi slt, %258, %262 : vector<64x32xi32>
    %cst_34 = arith.constant 0.000000e+00 : f32
    %264 = vector.broadcast %cst_34 : f32 to vector<64x32xf32>
    %265 = arith.select %263, %257, %264 : vector<64x32xi1>, vector<64x32xf32>
    %cst_35 = arith.constant dense<0.000000e+00> : vector<64x128xf32>
    %266 = tpu.matmul %265, %2, %cst_35 {dimension_numbers = #tpu.dot_dimension_numbers<[1], [0], [0], [1], [0, 0, 1, 1], [], []>} : vector<64x32xf32>, vector<32x128xf32>, vector<64x128xf32> -> vector<64x128xf32>
    %267 = vector.broadcast %7 : vector<1x128xf32> to vector<64x128xf32>
    %268 = arith.addf %266, %267 : vector<64x128xf32>
    %c0_36 = arith.constant 0 : index
    %c0_37 = arith.constant 0 : index
    %269 = vector.load %arg2[%c0_36, %c0_37] : memref<64x128xf32, #tpu.memory_space<vmem>>, vector<64x128xf32>
    tpu.vector_store %arg2[%c0_36, %c0_37], %268 {strides = array<i32>} : memref<64x128xf32, #tpu.memory_space<vmem>>, vector<64x128xf32>,
    return
  }
}

</mosaic_0001>

<bundles_post_ra>
// kernel: decoder_forward.1
= control target key start
LH: loop header
LB: loop body
LE: loop exit
PB: predicated region body
PF: predicated region fallthrough
CT: control target
= control target key end

     0   :  { %v1696_v0 = vmov 0   ;;  %v1697_v15 = vmov 0.0|0.0   ;;  %v53_v31 = vlaneseq  ;;  %vm1698_vm0 = vmmov 0   ;;  %s1700_s11 = smov 64   ;;  %s1702_s16 = smov 32   ;;  %s2085_s0 = inlined_call_operand.vmem [shape: s32[128,1], index: 0, kind: input, shape index: {}]   ;;  %s2086_s1 = inlined_call_operand.vmem [shape: f32[208,128], index: 1, kind: input, shape index: {}]   ;;  %s2087_s2 = inlined_call_operand.vmem [shape: f32[64,128], index: 2, kind: output, shape index: {}]  }
   0x1   :  { %1647 = vset.pattern.permute.xlu1 %v1696_v0  ;;  %1646 = vset.pattern.permute.xlu0 %v1696_v0  ;;  %v39_v1 = vld [vmem:[%s2085_s0 + $0x10] sm:$0xff]  ;;  %v37_v2 = vld [vmem:[%s2085_s0] sm:$0xff]  ;;  %v40_v3 = vld [vmem:[%s2085_s0 + $0x18] sm:$0xff]  ;;  %v1699_v35 = vmov 0.0   ;;  %v1701_v49 = vmov 1.0   ;;  %vm211_vm9 = vcmask 261120  }
   0x2   :  { %62 = vperm.xlu1 %1647, %v39_v1   ;;  %56 = vperm.xlu0 %1646, %v37_v2   ;;  %v38_v4 = vld [vmem:[%s2085_s0 + $0x8] sm:$0xff]  ;;  %v11_v5 = vld [vmem:[%s2086_s1] sm:$0xff]  ;;  %v13_v7 = vld [vmem:[%s2086_s1 + $0x10] sm:$0xff]  ;;  %v1799_v34 = vshrl.u32 %v53_v31, 7  ;;  %v54_v46 = vand.u32 127, %v53_v31  ;;  %s1703_s17 = smov 96  }
   0x3   :  { %v12_v6 = vld [vmem:[%s2086_s1 + $0x8] sm:$0xff]  ;;  %v14_v8 = vld [vmem:[%s2086_s1 + $0x18] sm:$0xff]  ;;  %v15_v11 = vld [vmem:[%s2086_s1 + $0x20] sm:$0xff]  ;;  %1588 = vmatprep.subr.bf16.mxu1 %v1697_v15  ;;  %1461 = vmatprep.mubr.msk.f32.mxu1 %vm1698_vm0, %v1699_v35 }
   0x4   :  { %v1550_v9 = vpack.c.bf16 %v12_v6, %v11_v5  ;;  %v1554_v10 = vpack.c.bf16 %v14_v8, %v13_v7  ;;  %v16_v12 = vld [vmem:[%s2086_s1 + $0x28] sm:$0xff]  ;;  %v41_v14 = vld [vmem:[%s2085_s0 + $0x20] sm:$0xff]  ;;  %v17_v19 = vld [vmem:[%s2086_s1 + $0x30] sm:$0xff]  ;;  %v209_v40 = vsub.s32 1, %v1799_v34  ;;  %v97_v57 = vsub.s32 0, %v1799_v34 }
   0x5   :  { %v42_v13 = vld [vmem:[%s2085_s0 + $0x28] sm:$0xff]  ;;  %v1558_v16 = vpack.c.bf16 %v16_v12, %v15_v11  ;;  %v27_v17 = vld [vmem:[%s2086_s1 + $0x80] sm:$0xff]  ;;  %v18_v20 = vld [vmem:[%s2086_s1 + $0x38] sm:$0xff] }
   0x6   :  { %65 = vperm.xlu1 %1647, %v40_v3   ;;  %59 = vperm.xlu0 %1646, %v38_v4   ;;  %v28_v18 = vld [vmem:[%s2086_s1 + $0x88] sm:$0xff]  ;;  %v44_v22 = vld [vmem:[%s2085_s0 + $0x38] sm:$0xff]  ;;  %v43_v23 = vld [vmem:[%s2085_s0 + $0x30] sm:$0xff]  ;;  %v1562_v24 = vpack.c.bf16 %v18_v20, %v17_v19 }
   0x7   :  { %1551 = vmatprep.subr.bf16.mxu0 %v1550_v9  ;;  %v1768_v21 = vpack.c.bf16 %v28_v18, %v27_v17  ;;  %v19_v25 = vld [vmem:[%s2086_s1 + $0x40] sm:$0xff]  ;;  %v20_v26 = vld [vmem:[%s2086_s1 + $0x48] sm:$0xff]  ;;  %v29_v27 = vld [vmem:[%s2086_s1 + $0x90] sm:$0xff] }
   0x8   :  { %1553 = vmatpush3.bf16.msra.mxu0 %v1550_v9  ;;  %v30_v28 = vld [vmem:[%s2086_s1 + $0x98] sm:$0xff]  ;;  %v1566_v30 = vpack.c.bf16 %v20_v26, %v19_v25  ;;  %v21_v32 = vld [vmem:[%s2086_s1 + $0x50] sm:$0xff]  ;;  %v23_v37 = vld [vmem:[%s2086_s1 + $0x60] sm:$0xff] }
   0x9   :  { %1555 = vmatprep.subr.bf16.mxu0 %v1554_v10  ;;  %1590 = vmatpush3.bf16.msra.mxu1 %v1768_v21  ;;  %v1790_v29 = vpack.c.bf16 %v30_v28, %v29_v27  ;;  %v22_v33 = vld [vmem:[%s2086_s1 + $0x58] sm:$0xff]  ;;  %v24_v38 = vld [vmem:[%s2086_s1 + $0x68] sm:$0xff]  ;;  %v1813_v39 = vld [vmem:[%s2086_s1 + $0xc0] sm:$0xff] }
   0xa   :  { %71 = vperm.xlu1 %1647, %v42_v13   ;;  %68 = vperm.xlu0 %1646, %v41_v14   ;;  %v1570_v36 = vpack.c.bf16 %v22_v33, %v21_v32  ;;  %v1574_v41 = vpack.c.bf16 %v24_v38, %v23_v37  ;;  %v210_v42 = vrot.slane %v1813_v39, %v209_v40  ;;  %v25_v43 = vld [vmem:[%s2086_s1 + $0x70] sm:$0xff]  ;;  %v26_v44 = vld [vmem:[%s2086_s1 + $0x78] sm:$0xff]  ;;  %v36_v56 = vld [vmem:[%s2086_s1 + $0xc8] sm:$0xff] }
   0xb   :  { %1591 = vmatprep.subr.bf16.mxu1 %v1697_v15  ;;  %v1578_v45 = vpack.c.bf16 %v26_v44, %v25_v43  ;;  %v98_v58 = vrot.slane %v1813_v39, %v97_v57  ;;  %v45_v27 = vld [vmem:[%s2085_s0 + $0x40] sm:$0xff] }
   0xc   :  { %1557 = vmatpush3.bf16.msra.mxu0 %v1554_v10 }
   0xd   :  { %1559 = vmatprep.subr.bf16.mxu0 %v1558_v16  ;;  %1593 = vmatpush3.bf16.msra.mxu1 %v1790_v29 }
   0xe   :  { %77 = vperm.xlu1 %1647, %v44_v22   ;;  %74 = vperm.xlu0 %1646, %v43_v23  }
   0xf   :  { %1594 = vmatprep.subr.bf16.mxu1 %v1697_v15 }
  0x10   :  { %1561 = vmatpush3.bf16.msra.mxu0 %v1558_v16 }
  0x11   :  { %1563 = vmatprep.subr.bf16.mxu0 %v1562_v24 }
  0x12   :  { %293 = vrot.lane.b32.xlu0 %v210_v42, %s1700_s11 }
  0x14   :  { %1565 = vmatpush3.bf16.msra.mxu0 %v1562_v24 }
  0x15   :  { %1567 = vmatprep.subr.bf16.mxu0 %v1566_v30 }
  0x18   :  { %1569 = vmatpush3.bf16.msra.mxu0 %v1566_v30 }
  0x19   :  { %1571 = vmatprep.subr.bf16.mxu0 %v1570_v36 }
  0x1c   :  { %1573 = vmatpush3.bf16.msra.mxu0 %v1570_v36 }
  0x1d   :  { %1575 = vmatprep.subr.bf16.mxu0 %v1574_v41 }
  0x20   :  { %1577 = vmatpush3.bf16.msra.mxu0 %v1574_v41 }
  0x21   :  { %1579 = vmatprep.subr.bf16.mxu0 %v1578_v45 }
  0x24   :  { %1581 = vmatpush3.bf16.msra.mxu0 %v1578_v45 }
  0x25   :  { %1582 = vmatprep.subr.bf16.mxu0 %v1697_v15 }
  0x81   :  { %v63_v47 = vpop.permute.xlu1 %62  ;;  %v57_v48 = vpop.permute.xlu0 %56 }
  0x82   :  { %vm79_vm1 = vcmp.eq.s32.totalorder %v54_v46, %v57_v48  ;;  %vm81_vm2 = vcmp.eq.s32.totalorder %v54_v46, %v63_v47 }
  0x83   :  { %1430 = vmatprep.mubr.msk.f32.mxu0 %vm79_vm1, %v1701_v49 }
  0x85   :  { %v66_v50 = vpop.permute.xlu1 %65  ;;  %v60_v51 = vpop.permute.xlu0 %59 }
  0x86   :  { %vm80_vm3 = vcmp.eq.s32.totalorder %v54_v46, %v60_v51  ;;  %vm82_vm4 = vcmp.eq.s32.totalorder %v54_v46, %v66_v50 }
  0x87   :  { %1431 = vmatmul.mubr.msk.f32.vlgmr.msra.gmra.mrb[0].mxu0 %vm80_vm3, %v1701_v49 }
  0x88   :  { %1584 = vmatpush3.bf16.msra.mxu0 %v1768_v21  ;;  %1433 = vmatprep.mubr.msk.f32.mxu0 %vm81_vm2, %v1701_v49 }
  0x89   :  { %v72_v52 = vpop.permute.xlu1 %71  ;;  %v69_v53 = vpop.permute.xlu0 %68  ;;  %1585 = vmatprep.subr.bf16.mxu0 %v1697_v15 }
  0x8a   :  { %vm83_vm5 = vcmp.eq.s32.totalorder %v54_v46, %v69_v53  ;;  %vm84_vm6 = vcmp.eq.s32.totalorder %v54_v46, %v72_v52 }
  0x8b   :  { %1434 = vmatmul.mubr.msk.f32.gmra.mrb[2].mxu0 %vm82_vm4, %v1701_v49 }
  0x8c   :  { %1436 = vmatprep.mubr.msk.f32.mxu0 %vm83_vm5, %v1701_v49  ;;  %1587 = vmatpush3.bf16.msra.mxu0 %v1790_v29 }
  0x8d   :  { %v75_v54 = vpop.permute.xlu0 %74  ;;  %1612 = vmatprep.subr.bf16.mxu0 %v1697_v15  ;;  %v78_v55 = vpop.permute.xlu1 %77 }
  0x8e   :  { %vm85_vm7 = vcmp.eq.s32.totalorder %v54_v46, %v75_v54  ;;  %vm86_vm8 = vcmp.eq.s32.totalorder %v54_v46, %v78_v55 }
  0x8f   :  { %1437 = vmatmul.mubr.msk.f32.gmra.mrb[4].mxu0 %vm84_vm6, %v1701_v49 }
  0x90   :  { %1439 = vmatprep.mubr.msk.f32.mxu0 %vm85_vm7, %v1701_v49 }
  0x91   :  { %v1857_v11 = vpop.permute.xlu0 %293 }
  0x93   :  { %1440 = vmatmul.mubr.msk.f32.gmra.mrb[6].mxu0 %vm86_vm8, %v1701_v49 }
  0x94   :  { %1450 = vmatprep.mubr.msk.f32.mxu0 %vm1698_vm0, %v1699_v35 }
  0x97   :  { %1451 = vmatmul.mubr.msk.f32.vlgmr.msra.gmra.mrb[8].mxu0 %vm211_vm9, %v36_v56 }
  0x98   :  { %1614 = vmatpush3.bf16.msra.mxu0 %v1768_v21  ;;  %1505 = vmatprep.mubr.msk.f32.mxu0 %vm1698_vm0, %v1699_v35 }
  0x99   :  { %1615 = vmatprep.subr.bf16.mxu0 %v1697_v15 }
  0x9c   :  { %1617 = vmatpush3.bf16.msra.mxu0 %v1790_v29 }
  0x9d   :  { %1624 = vmatprep.subr.bf16.mxu0 %v1697_v15 }
 0x15a   :  { %v1432_v59 = vpop.f32.mrb[0].mxu0 }
 0x15b   :  { %v1843_v60 = vadd.f32 %v1432_v59, %v98_v58  ;;  %v165_v61 = vpop.f32.mrb[1].mxu0 }
 0x15c   :  { %v166_v62 = vadd.f32 %v165_v61, %v98_v58 }
 0x15e   :  { %v1435_v63 = vpop.f32.mrb[2].mxu0 }
 0x15f   :  { %v1845_v0 = vadd.f32 %v1435_v63, %v98_v58  ;;  %v175_v1 = vpop.f32.mrb[3].mxu0 }
 0x160   :  { %v1847_v2 = vadd.f32 %v175_v1, %v98_v58 }
 0x162   :  { %v1438_v3 = vpop.f32.mrb[4].mxu0 }
 0x163   :  { %v1849_v4 = vadd.f32 %v1438_v3, %v98_v58  ;;  %v185_v5 = vpop.f32.mrb[5].mxu0 }
 0x164   :  { %v1851_v6 = vadd.f32 %v185_v5, %v98_v58 }
 0x166   :  { %v1441_v7 = vpop.f32.mrb[6].mxu0 }
 0x167   :  { %v1853_v8 = vadd.f32 %v1441_v7, %v98_v58  ;;  %v195_v9 = vpop.f32.mrb[7].mxu0 }
 0x168   :  { %v1855_v10 = vadd.f32 %v195_v9, %v98_v58 }
 0x16a   :  { %v281_v12 = vpop.f32.mrb[8].mxu0 }
 0x16b   :  { %v1452_v13 = vpop.f32.mrb[9].mxu0  ;;  %v296_v14 = vadd.f32 %v1857_v11, %v281_v12  ;;  %v285_v16 = vadd.f32 %v281_v12, %v166_v62 }
 0x16d   :  { %298 = vrot.lane.b32.xlu1 %v296_v14, %s1700_s11  ;;  %v1299_v17 = vmul.f32 -1.442695, %v285_v16 }
 0x16f   :  { %1648 = vpow2.f32 %v1299_v17 }
 0x179   :  { %v1649_v18 = vpop.eup %1648 }
 0x17a   :  { %v289_v19 = vadd.f32 1.0, %v1649_v18 }
 0x17c   :  { %1650 = vrcp.f32 %v289_v19 }
 0x186   :  { %v1651_v20 = vpop.eup %1650 }
 0x1df   :  { %v299_v22 = vpop.permute.xlu1 %298 }
 0x1e0   :  { %v301_v23 = vmul.f32 %v1651_v20, %v299_v22 }
 0x1e2   :  { %303 = vrot.lane.b32.xlu0 %v301_v23, %s1700_s11 }
 0x254   :  { %v304_v24 = vpop.permute.xlu0 %303 }
 0x255   :  { %v306_v25 = vadd.f32 %v304_v24, %v166_v62 }
 0x257   :  { %1652 = vtanh.f32 %v306_v25 }
 0x261   :  { %v1653_v26 = vpop.eup %1652 }
 0x262   :  { %309 = vrot.lane.b32.xlu1 %v1653_v26, %s1700_s11 }
 0x266   :  { %205 = vperm.xlu1 %1647, %v45_v27  }
 0x26a   :  { %324 = vrot.lane.b32.xlu1 %v36_v56, %s1700_s11 }
 0x2d4   :  { %v310_v28 = vpop.permute.xlu1 %309 }
 0x2d5   :  { %v312_v30 = vsub.f32 %v36_v56, %v310_v28 }
 0x2d7   :  { %314 = vrot.lane.b32.xlu0 %v312_v30, %s1702_s16 }
 0x2e5   :  { %v1869_v33 = vpop.permute.xlu1 %205 }
 0x2e6   :  { %vm323_vm10 = vcmp.gt.s32.totalorder %v1869_v33, 0  ;;  %vm433_vm11 = vcmp.gt.s32.totalorder %v1869_v33, 1  ;;  %vm540_vm12 = vcmp.gt.s32.totalorder %v1869_v33, 2  ;;  %vm647_vm13 = vcmp.gt.s32.totalorder %v1869_v33, 3 }
 0x2e7   :  { %vm754_vm14 = vcmp.gt.s32.totalorder %v1869_v33, 4  ;;  %vm861_vm15 = vcmp.gt.s32.totalorder %v1869_v33, 5 }
 0x2e9   :  { %v325_v37 = vpop.permute.xlu1 %324 }
 0x349   :  { %v315_v31 = vpop.permute.xlu0 %314 }
 0x34a   :  { %v317_v32 = vmul.f32 %v1651_v20, %v315_v31 }
 0x34c   :  { %319 = vrot.lane.b32.xlu0 %v317_v32, %s1702_s16 }
 0x3be   :  { %v320_v36 = vpop.permute.xlu0 %319 }
 0x3bf   :  { %v1871_v38 = vadd.f32 %v1653_v26, %v320_v36 }
 0x3c1   :  { %v327_v40 = vsel %vm323_vm10, %v1871_v38, %v325_v37 }
 0x3c2   :  { %329 = vrot.lane.b32.xlu0 %v327_v40, %s1700_s11 }
 0x434   :  { %v330_v41 = vpop.permute.xlu0 %329 }
 0x435   :  { %1462 = vmatmul.mubr.msk.f32.vlgmr.msra.gmra.mrb[0].mxu1 %vm211_vm9, %v330_v41 }
 0x436   :  { %1596 = vmatpush3.bf16.msra.mxu1 %v1768_v21  ;;  %1472 = vmatprep.mubr.msk.f32.mxu1 %vm1698_vm0, %v1699_v35 }
 0x437   :  { %1597 = vmatprep.subr.bf16.mxu1 %v1697_v15 }
 0x43a   :  { %1599 = vmatpush3.bf16.msra.mxu1 %v1790_v29 }
 0x43b   :  { %1600 = vmatprep.subr.bf16.mxu1 %v1697_v15 }
 0x508   :  { %v399_v42 = vpop.f32.mrb[0].mxu1 }
 0x509   :  { %v410_v43 = vadd.f32 %v399_v42, %v1857_v11  ;;  %v1463_v44 = vpop.f32.mrb[1].mxu1  ;;  %v403_v45 = vadd.f32 %v399_v42, %v1843_v60 }
 0x50b   :  { %412 = vrot.lane.b32.xlu1 %v410_v43, %s1700_s11  ;;  %v1301_v46 = vmul.f32 -1.442695, %v403_v45 }
 0x50d   :  { %1654 = vpow2.f32 %v1301_v46 }
 0x517   :  { %v1655_v47 = vpop.eup %1654 }
 0x518   :  { %v407_v48 = vadd.f32 1.0, %v1655_v47 }
 0x51a   :  { %1656 = vrcp.f32 %v407_v48 }
 0x524   :  { %v1657_v49 = vpop.eup %1656 }
 0x57d   :  { %v413_v50 = vpop.permute.xlu1 %412 }
 0x57e   :  { %v415_v51 = vmul.f32 %v1657_v49, %v413_v50 }
 0x580   :  { %417 = vrot.lane.b32.xlu0 %v415_v51, %s1700_s11 }
 0x5f2   :  { %v418_v52 = vpop.permute.xlu0 %417 }
 0x5f3   :  { %v420_v53 = vadd.f32 %v418_v52, %v1843_v60 }
 0x5f5   :  { %1658 = vtanh.f32 %v420_v53 }
 0x5ff   :  { %v1659_v54 = vpop.eup %1658 }
 0x600   :  { %v422_v55 = vsub.f32 %v327_v40, %v1659_v54 }
 0x602   :  { %424 = vrot.lane.b32.xlu1 %v422_v55, %s1703_s17 }
 0x674   :  { %v425_v56 = vpop.permute.xlu1 %424 }
 0x675   :  { %v427_v57 = vmul.f32 %v1657_v49, %v425_v56 }
 0x677   :  { %429 = vrot.lane.b32.xlu0 %v427_v57, %s1702_s16 }
 0x6e9   :  { %v430_v58 = vpop.permute.xlu0 %429 }
 0x6ea   :  { %v1890_v59 = vadd.f32 %v1659_v54, %v430_v58 }
 0x6ec   :  { %v434_v61 = vsel %vm433_vm11, %v1890_v59, %v327_v40 }
 0x6ed   :  { %436 = vrot.lane.b32.xlu1 %v434_v61, %s1700_s11 }
 0x75f   :  { %v437_v60 = vpop.permute.xlu1 %436 }
 0x760   :  { %1473 = vmatmul.mubr.msk.f32.vlgmr.msra.gmra.mrb[2].mxu1 %vm211_vm9, %v437_v60 }
 0x761   :  { %1602 = vmatpush3.bf16.msra.mxu1 %v1768_v21  ;;  %1483 = vmatprep.mubr.msk.f32.mxu1 %vm1698_vm0, %v1699_v35 }
 0x762   :  { %1603 = vmatprep.subr.bf16.mxu1 %v1697_v15 }
 0x765   :  { %1605 = vmatpush3.bf16.msra.mxu1 %v1790_v29 }
 0x766   :  { %1606 = vmatprep.subr.bf16.mxu1 %v1697_v15 }
 0x833   :  { %v506_v62 = vpop.f32.mrb[2].mxu1 }
 0x834   :  { %v517_v63 = vadd.f32 %v506_v62, %v1857_v11  ;;  %v1474_v1 = vpop.f32.mrb[3].mxu1  ;;  %v510_v3 = vadd.f32 %v506_v62, %v1847_v2 }
 0x836   :  { %519 = vrot.lane.b32.xlu0 %v517_v63, %s1700_s11  ;;  %v1303_v5 = vmul.f32 -1.442695, %v510_v3 }
 0x838   :  { %1660 = vpow2.f32 %v1303_v5 }
 0x842   :  { %v1661_v7 = vpop.eup %1660 }
 0x843   :  { %v514_v9 = vadd.f32 1.0, %v1661_v7 }
 0x845   :  { %1662 = vrcp.f32 %v514_v9 }
 0x84f   :  { %v1663_v12 = vpop.eup %1662 }
 0x8a8   :  { %v520_v13 = vpop.permute.xlu0 %519 }
 0x8a9   :  { %v522_v14 = vmul.f32 %v1663_v12, %v520_v13 }
 0x8ab   :  { %524 = vrot.lane.b32.xlu1 %v522_v14, %s1700_s11 }
 0x91d   :  { %v525_v16 = vpop.permute.xlu1 %524 }
 0x91e   :  { %v527_v17 = vadd.f32 %v525_v16, %v1847_v2 }
 0x920   :  { %1664 = vtanh.f32 %v527_v17 }
 0x92a   :  { %v1665_v18 = vpop.eup %1664 }
 0x92b   :  { %v529_v19 = vsub.f32 %v434_v61, %v1665_v18 }
 0x92d   :  { %531 = vrot.lane.b32.xlu0 %v529_v19, %s1703_s17 }
 0x99f   :  { %v532_v20 = vpop.permute.xlu0 %531 }
 0x9a0   :  { %v534_v22 = vmul.f32 %v1663_v12, %v532_v20 }
 0x9a2   :  { %536 = vrot.lane.b32.xlu1 %v534_v22, %s1702_s16 }
 0xa14   :  { %v537_v23 = vpop.permute.xlu1 %536 }
 0xa15   :  { %v1909_v24 = vadd.f32 %v1665_v18, %v537_v23 }
 0xa17   :  { %v541_v25 = vsel %vm540_vm12, %v1909_v24, %v434_v61 }
 0xa18   :  { %543 = vrot.lane.b32.xlu0 %v541_v25, %s1700_s11 }
 0xa8a   :  { %v544_v26 = vpop.permute.xlu0 %543 }
 0xa8b   :  { %1484 = vmatmul.mubr.msk.f32.vlgmr.msra.gmra.mrb[4].mxu1 %vm211_vm9, %v544_v26 }
 0xa8c   :  { %1608 = vmatpush3.bf16.msra.mxu1 %v1768_v21  ;;  %1494 = vmatprep.mubr.msk.f32.mxu1 %vm1698_vm0, %v1699_v35 }
 0xa8d   :  { %1609 = vmatprep.subr.bf16.mxu1 %v1697_v15 }
 0xa90   :  { %1611 = vmatpush3.bf16.msra.mxu1 %v1790_v29 }
 0xa91   :  { %1618 = vmatprep.subr.bf16.mxu1 %v1697_v15 }
 0xb5e   :  { %v613_v2 = vpop.f32.mrb[4].mxu1 }
 0xb5f   :  { %v624_v27 = vadd.f32 %v613_v2, %v1857_v11  ;;  %v1485_v28 = vpop.f32.mrb[5].mxu1  ;;  %v617_v30 = vadd.f32 %v613_v2, %v1845_v0 }
 0xb61   :  { %626 = vrot.lane.b32.xlu1 %v624_v27, %s1700_s11  ;;  %v1305_v31 = vmul.f32 -1.442695, %v617_v30 }
 0xb63   :  { %1666 = vpow2.f32 %v1305_v31 }
 0xb6d   :  { %v1667_v32 = vpop.eup %1666 }
 0xb6e   :  { %v621_v36 = vadd.f32 1.0, %v1667_v32 }
 0xb70   :  { %1668 = vrcp.f32 %v621_v36 }
 0xb7a   :  { %v1669_v37 = vpop.eup %1668 }
 0xbd3   :  { %v627_v40 = vpop.permute.xlu1 %626 }
 0xbd4   :  { %v629_v41 = vmul.f32 %v1669_v37, %v627_v40 }
 0xbd6   :  { %631 = vrot.lane.b32.xlu0 %v629_v41, %s1700_s11 }
 0xc48   :  { %v632_v42 = vpop.permute.xlu0 %631 }
 0xc49   :  { %v634_v43 = vadd.f32 %v632_v42, %v1845_v0 }
 0xc4b   :  { %1670 = vtanh.f32 %v634_v43 }
 0xc55   :  { %v1671_v44 = vpop.eup %1670 }
 0xc56   :  { %v636_v45 = vsub.f32 %v541_v25, %v1671_v44 }
 0xc58   :  { %638 = vrot.lane.b32.xlu1 %v636_v45, %s1703_s17 }
 0xcca   :  { %v639_v46 = vpop.permute.xlu1 %638 }
 0xccb   :  { %v641_v47 = vmul.f32 %v1669_v37, %v639_v46 }
 0xccd   :  { %643 = vrot.lane.b32.xlu0 %v641_v47, %s1702_s16 }
 0xd3f   :  { %v644_v48 = vpop.permute.xlu0 %643 }
 0xd40   :  { %v1928_v49 = vadd.f32 %v1671_v44, %v644_v48 }
 0xd42   :  { %v648_v50 = vsel %vm647_vm13, %v1928_v49, %v541_v25 }
 0xd43   :  { %650 = vrot.lane.b32.xlu1 %v648_v50, %s1700_s11 }
 0xdb5   :  { %v651_v51 = vpop.permute.xlu1 %650 }
 0xdb6   :  { %1495 = vmatmul.mubr.msk.f32.vlgmr.msra.gmra.mrb[6].mxu1 %vm211_vm9, %v651_v51 }
 0xdb7   :  { %1620 = vmatpush3.bf16.msra.mxu1 %v1768_v21  ;;  %1516 = vmatprep.mubr.msk.f32.mxu1 %vm1698_vm0, %v1699_v35 }
 0xdb8   :  { %1621 = vmatprep.subr.bf16.mxu1 %v1697_v15 }
 0xdbb   :  { %1623 = vmatpush3.bf16.msra.mxu1 %v1790_v29 }
 0xe89   :  { %v720_v0 = vpop.f32.mrb[6].mxu1 }
 0xe8a   :  { %v731_v52 = vadd.f32 %v720_v0, %v1857_v11  ;;  %v1496_v53 = vpop.f32.mrb[7].mxu1  ;;  %v724_v54 = vadd.f32 %v720_v0, %v1851_v6 }
 0xe8c   :  { %733 = vrot.lane.b32.xlu0 %v731_v52, %s1700_s11  ;;  %v1307_v55 = vmul.f32 -1.442695, %v724_v54 }
 0xe8e   :  { %1672 = vpow2.f32 %v1307_v55 }
 0xe98   :  { %v1673_v56 = vpop.eup %1672 }
 0xe99   :  { %v728_v57 = vadd.f32 1.0, %v1673_v56 }
 0xe9b   :  { %1674 = vrcp.f32 %v728_v57 }
 0xea5   :  { %v1675_v58 = vpop.eup %1674 }
 0xefe   :  { %v734_v61 = vpop.permute.xlu0 %733 }
 0xeff   :  { %v736_v60 = vmul.f32 %v1675_v58, %v734_v61 }
 0xf01   :  { %738 = vrot.lane.b32.xlu1 %v736_v60, %s1700_s11 }
 0xf73   :  { %v739_v62 = vpop.permute.xlu1 %738 }
 0xf74   :  { %v741_v63 = vadd.f32 %v739_v62, %v1851_v6 }
 0xf76   :  { %1676 = vtanh.f32 %v741_v63 }
 0xf80   :  { %v1677_v1 = vpop.eup %1676 }
 0xf81   :  { %v743_v3 = vsub.f32 %v648_v50, %v1677_v1 }
 0xf83   :  { %745 = vrot.lane.b32.xlu0 %v743_v3, %s1703_s17 }
 0xff5   :  { %v746_v5 = vpop.permute.xlu0 %745 }
 0xff6   :  { %v748_v7 = vmul.f32 %v1675_v58, %v746_v5 }
 0xff8   :  { %750 = vrot.lane.b32.xlu1 %v748_v7, %s1702_s16  ;;  %v46_v7 = vld [vmem:[%s2085_s0 + $0x48] sm:$0xff] }
0x106a   :  { %v751_v9 = vpop.permute.xlu1 %750 }
0x106b   :  { %v1946_v12 = vadd.f32 %v1677_v1, %v751_v9  ;;  %v50_v9 = vld [vmem:[%s2085_s0 + $0x68] sm:$0xff] }
0x106d   :  { %v755_v13 = vsel %vm754_vm14, %v1946_v12, %v648_v50 }
0x106e   :  { %757 = vrot.lane.b32.xlu0 %v755_v13, %s1700_s11 }
0x10e0   :  { %v758_v14 = vpop.permute.xlu0 %757 }
0x10e1   :  { %1506 = vmatmul.mubr.msk.f32.vlgmr.msra.gmra.mrb[10].mxu0 %vm211_vm9, %v758_v14  ;;  %v1105_v14 = vmul.u32 8, %v1869_v33 }
0x10e2   :  { %1626 = vmatpush3.bf16.msra.mxu0 %v1768_v21  ;;  %1527 = vmatprep.mubr.msk.f32.mxu0 %vm1698_vm0, %v1699_v35  ;;  %vm968_vm0 = vcmp.gt.s32.totalorder %v1869_v33, 6  ;;  %v47_v33 = vld [vmem:[%s2085_s0 + $0x50] sm:$0xff] }
0x10e3   :  { %1627 = vmatprep.subr.bf16.mxu0 %v1697_v15  ;;  %vm1113_vm1 = vcmp.lt.s32.totalorder %v1799_v34, %v1105_v14 }
0x10e6   :  { %1629 = vmatpush3.bf16.msra.mxu0 %v1790_v29 }
0x11b4   :  { %v827_v6 = vpop.f32.mrb[10].mxu0 }
0x11b5   :  { %v838_v16 = vadd.f32 %v827_v6, %v1857_v11  ;;  %v1507_v17 = vpop.f32.mrb[11].mxu0  ;;  %v831_v18 = vadd.f32 %v827_v6, %v1849_v4  ;;  %v1121_v6 = vsel %vm1113_vm1, %v1871_v38, 0.0  ;;  %v49_v38 = vld [vmem:[%s2085_s0 + $0x60] sm:$0xff] }
0x11b7   :  { %840 = vrot.lane.b32.xlu1 %v838_v16, %s1700_s11  ;;  %v1309_v19 = vmul.f32 -1.442695, %v831_v18 }
0x11b9   :  { %1678 = vpow2.f32 %v1309_v19 }
0x11c3   :  { %v1679_v20 = vpop.eup %1678 }
0x11c4   :  { %v835_v22 = vadd.f32 1.0, %v1679_v20 }
0x11c6   :  { %1680 = vrcp.f32 %v835_v22 }
0x11d0   :  { %v1681_v21 = vpop.eup %1680 }
0x1229   :  { %v841_v23 = vpop.permute.xlu1 %840 }
0x122a   :  { %v843_v35 = vmul.f32 %v1681_v21, %v841_v23 }
0x122c   :  { %845 = vrot.lane.b32.xlu0 %v843_v35, %s1700_s11  ;;  %v31_v35 = vld [vmem:[%s2086_s1 + $0xa0] sm:$0xff] }
0x129e   :  { %v846_v15 = vpop.permute.xlu0 %845 }
0x129f   :  { %v848_v29 = vadd.f32 %v846_v15, %v1849_v4  ;;  %v32_v15 = vld [vmem:[%s2086_s1 + $0xa8] sm:$0xff] }
0x12a1   :  { %1682 = vtanh.f32 %v848_v29 }
0x12ab   :  { %v1683_v25 = vpop.eup %1682 }
0x12ac   :  { %v850_v26 = vsub.f32 %v755_v13, %v1683_v25 }
0x12ae   :  { %852 = vrot.lane.b32.xlu1 %v850_v26, %s1703_s17  ;;  %v33_v26 = vld [vmem:[%s2086_s1 + $0xb0] sm:$0xff] }
0x1320   :  { %v853_v2 = vpop.permute.xlu1 %852 }
0x1321   :  { %v855_v27 = vmul.f32 %v1681_v21, %v853_v2  ;;  %v51_v21 = vld [vmem:[%s2085_s0 + $0x70] sm:$0xff]  ;;  %v34_v2 = vld [vmem:[%s2086_s1 + $0xb8] sm:$0xff] }
0x1323   :  { %857 = vrot.lane.b32.xlu0 %v855_v27, %s1702_s16  ;;  %v1634_v27 = vpack.c.bf16 %v34_v2, %v33_v26 }
0x1395   :  { %v858_v28 = vpop.permute.xlu0 %857 }
0x1396   :  { %v1964_v30 = vadd.f32 %v1683_v25, %v858_v28  ;;  %v1630_v25 = vpack.c.bf16 %v32_v15, %v31_v35  ;;  %v1077_v28 = vadd.s32 8, %v1799_v34 }
0x1398   :  { %v862_v31 = vsel %vm861_vm15, %v1964_v30, %v755_v13  ;;  %v52_v13 = vld [vmem:[%s2085_s0 + $0x78] sm:$0xff]  ;;  %1631 = vmatprep.subr.bf16.mxu1 %v1630_v25 }
0x1399   :  { %864 = vrot.lane.b32.xlu1 %v862_v31, %s1700_s11 }
0x140b   :  { %v865_v32 = vpop.permute.xlu1 %864 }
0x140c   :  { %1517 = vmatmul.mubr.msk.f32.vlgmr.msra.gmra.mrb[8].mxu1 %vm211_vm9, %v865_v32 }
0x140d   :  { %1633 = vmatpush3.bf16.msra.mxu1 %v1630_v25 }
0x140e   :  { %1635 = vmatprep.subr.bf16.mxu1 %v1634_v27 }
0x1411   :  { %1637 = vmatpush3.bf16.msra.mxu1 %v1634_v27 }
0x14df   :  { %v934_v4 = vpop.f32.mrb[8].mxu1 }
0x14e0   :  { %v945_v36 = vadd.f32 %v934_v4, %v1857_v11  ;;  %v1518_v37 = vpop.f32.mrb[9].mxu1  ;;  %v938_v40 = vadd.f32 %v934_v4, %v1855_v10 }
0x14e2   :  { %947 = vrot.lane.b32.xlu0 %v945_v36, %s1700_s11  ;;  %v1311_v41 = vmul.f32 -1.442695, %v938_v40  ;;  %v1079_v36 = vadd.s32 24, %v1799_v34 }
0x14e4   :  { %1684 = vpow2.f32 %v1311_v41  ;;  %v1081_v41 = vadd.s32 40, %v1799_v34 }
0x14ee   :  { %v1685_v42 = vpop.eup %1684 }
0x14ef   :  { %v942_v43 = vadd.f32 1.0, %v1685_v42 }
0x14f1   :  { %1686 = vrcp.f32 %v942_v43 }
0x14fb   :  { %v1687_v44 = vpop.eup %1686 }
0x1554   :  { %v948_v45 = vpop.permute.xlu0 %947 }
0x1555   :  { %v950_v46 = vmul.f32 %v1687_v44, %v948_v45  ;;  %v1078_v45 = vadd.s32 16, %v1799_v34 }
0x1557   :  { %952 = vrot.lane.b32.xlu1 %v950_v46, %s1700_s11 }
0x15c9   :  { %v953_v47 = vpop.permute.xlu1 %952 }
0x15ca   :  { %v955_v48 = vadd.f32 %v953_v47, %v1855_v10 }
0x15cc   :  { %1688 = vtanh.f32 %v955_v48 }
0x15d6   :  { %v1689_v50 = vpop.eup %1688 }
0x15d7   :  { %v957_v51 = vsub.f32 %v862_v31, %v1689_v50 }
0x15d9   :  { %959 = vrot.lane.b32.xlu0 %v957_v51, %s1703_s17 }
0x164b   :  { %v960_v0 = vpop.permute.xlu0 %959 }
0x164c   :  { %v962_v52 = vmul.f32 %v1687_v44, %v960_v0 }
0x164e   :  { %964 = vrot.lane.b32.xlu1 %v962_v52, %s1702_s16 }
0x16c0   :  { %v965_v53 = vpop.permute.xlu1 %964 }
0x16c1   :  { %v1977_v54 = vadd.f32 %v1689_v50, %v965_v53 }
0x16c3   :  { %v969_v55 = vsel %vm968_vm0, %v1977_v54, %v862_v31 }
0x16c4   :  { %971 = vrot.lane.b32.xlu0 %v969_v55, %s1700_s11 }
0x1736   :  { %v972_v56 = vpop.permute.xlu0 %971 }
0x1737   :  { %1528 = vmatmul.mubr.msk.f32.vlgmr.msra.gmra.mrb[12].mxu0 %vm211_vm9, %v972_v56 }
0x180a   :  { %v1041_v10 = vpop.f32.mrb[12].mxu0 }
0x180b   :  { %v1052_v57 = vadd.f32 %v1041_v10, %v1857_v11  ;;  %v1529_v58 = vpop.f32.mrb[13].mxu0  ;;  %v1045_v61 = vadd.f32 %v1041_v10, %v1853_v8  ;;  %v48_v11 = vld [vmem:[%s2085_s0 + $0x58] sm:$0xff] }
0x180d   :  { %1054 = vrot.lane.b32.xlu1 %v1052_v57, %s1700_s11  ;;  %v1313_v60 = vmul.f32 -1.442695, %v1045_v61 }
0x180f   :  { %1690 = vpow2.f32 %v1313_v60 }
0x1819   :  { %v1691_v62 = vpop.eup %1690 }
0x181a   :  { %v1049_v63 = vadd.f32 1.0, %v1691_v62 }
0x181c   :  { %1692 = vrcp.f32 %v1049_v63 }
0x1826   :  { %v1693_v1 = vpop.eup %1692 }
0x187f   :  { %v1055_v3 = vpop.permute.xlu1 %1054 }
0x1880   :  { %v1057_v5 = vmul.f32 %v1693_v1, %v1055_v3 }
0x1882   :  { %1059 = vrot.lane.b32.xlu0 %v1057_v5, %s1700_s11 }
0x1886   :  { %1085 = vperm.xlu0 %1646, %v46_v7  }
0x188a   :  { %1091 = vperm.xlu0 %1646, %v48_v11  }
0x188e   :  { %1097 = vperm.xlu0 %1646, %v50_v9  }
0x1892   :  { %1103 = vperm.xlu0 %1646, %v52_v13  }
0x1896   :  { %1141 = vrot.lane.b32.xlu0 %v1121_v6, %s1700_s11 }
0x18f4   :  { %v1060_v16 = vpop.permute.xlu0 %1059 }
0x18f5   :  { %v1062_v17 = vadd.f32 %v1060_v16, %v1853_v8 }
0x18f7   :  { %1694 = vtanh.f32 %v1062_v17 }
0x1901   :  { %v2004_v18 = vpop.eup %1694 }
0x1902   :  { %v1064_v19 = vsub.f32 %v969_v55, %v2004_v18  ;;  %v1083_v55 = vadd.s32 56, %v1799_v34 }
0x1904   :  { %1066 = vrot.lane.b32.xlu1 %v1064_v19, %s1703_s17 }
0x1905   :  { %v1086_v20 = vpop.permute.xlu0 %1085 }
0x1906   :  { %v1106_v31 = vmul.u32 8, %v1086_v20 }
0x1908   :  { %1088 = vperm.xlu1 %1647, %v47_v33   ;;  %vm1114_vm2 = vcmp.lt.s32.totalorder %v1077_v28, %v1106_v31 }
0x1909   :  { %v1092_v22 = vpop.permute.xlu0 %1091  ;;  %v1122_v40 = vsel %vm1114_vm2, %v1890_v59, 0.0  ;;  %v1080_v59 = vadd.s32 32, %v1799_v34 }
0x190a   :  { %v1108_v37 = vmul.u32 8, %v1092_v22 }
0x190c   :  { %1094 = vperm.xlu1 %1647, %v49_v38   ;;  %vm1116_vm3 = vcmp.lt.s32.totalorder %v1079_v36, %v1108_v37 }
0x190d   :  { %v1098_v8 = vpop.permute.xlu0 %1097  ;;  %v1124_v43 = vsel %vm1116_vm3, %v1928_v49, 0.0  ;;  %v1082_v49 = vadd.s32 48, %v1799_v34 }
0x190e   :  { %v1110_v42 = vmul.u32 8, %v1098_v8 }
0x1910   :  { %1100 = vperm.xlu1 %1647, %v51_v21   ;;  %vm1118_vm4 = vcmp.lt.s32.totalorder %v1081_v41, %v1110_v42 }
0x1911   :  { %v1104_v23 = vpop.permute.xlu0 %1103  ;;  %v1126_v44 = vsel %vm1118_vm4, %v1964_v30, 0.0 }
0x1915   :  { %v1142_v29 = vpop.permute.xlu0 %1141 }
0x1916   :  { %1538 = vmatprep.mubr.msk.f32.mxu1 %vm211_vm9, %v1142_v29 }
0x1976   :  { %v1067_v32 = vpop.permute.xlu1 %1066 }
0x1977   :  { %v1069_v4 = vmul.f32 %v1693_v1, %v1067_v32  ;;  %v1131_v1 = vsub.s32 2, %v1799_v34 }
0x1979   :  { %1071 = vrot.lane.b32.xlu1 %v1069_v4, %s1702_s16  ;;  %v1132_v3 = vrot.slane %v1813_v39, %v1131_v1 }
0x197d   :  { %1143 = vrot.lane.b32.xlu1 %v1122_v40, %s1700_s11 }
0x1981   :  { %1147 = vrot.lane.b32.xlu1 %v1124_v43, %s1700_s11 }
0x1985   :  { %1151 = vrot.lane.b32.xlu1 %v1126_v44, %s1700_s11 }
0x1987   :  { %v1089_v46 = vpop.permute.xlu1 %1088 }
0x1988   :  { %v1107_v47 = vmul.u32 8, %v1089_v46 }
0x198a   :  { %vm1115_vm5 = vcmp.lt.s32.totalorder %v1078_v45, %v1107_v47 }
0x198b   :  { %v1095_v48 = vpop.permute.xlu1 %1094  ;;  %v1123_v50 = vsel %vm1115_vm5, %v1909_v24, 0.0  ;;  %v1112_v24 = vmul.u32 8, %v1104_v23 }
0x198c   :  { %v1109_v51 = vmul.u32 8, %v1095_v48  ;;  %1145 = vrot.lane.b32.xlu0 %v1123_v50, %s1700_s11 }
0x198d   :  { %vm1120_vm8 = vcmp.lt.s32.totalorder %v1083_v55, %v1112_v24 }
0x198e   :  { %vm1117_vm6 = vcmp.lt.s32.totalorder %v1080_v59, %v1109_v51 }
0x198f   :  { %v1101_v0 = vpop.permute.xlu1 %1100  ;;  %v1125_v30 = vsel %vm1117_vm6, %v1946_v12, 0.0 }
0x1990   :  { %v1111_v52 = vmul.u32 8, %v1101_v0  ;;  %1149 = vrot.lane.b32.xlu0 %v1125_v30, %s1700_s11 }
0x1992   :  { %vm1119_vm7 = vcmp.lt.s32.totalorder %v1082_v49, %v1111_v52 }
0x1993   :  { %v1127_v53 = vsel %vm1119_vm7, %v1977_v54, 0.0 }
0x1994   :  { %1153 = vrot.lane.b32.xlu0 %v1127_v53, %s1700_s11 }
0x19eb   :  { %v1072_v56 = vpop.permute.xlu1 %1071 }
0x19ec   :  { %v1074_v10 = vadd.f32 %v2004_v18, %v1072_v56 }
0x19ee   :  { %v1128_v57 = vsel %vm1120_vm8, %v1074_v10, 0.0 }
0x19ef   :  { %v1144_v58 = vpop.permute.xlu1 %1143  ;;  %1155 = vrot.lane.b32.xlu1 %v1128_v57, %s1700_s11 }
0x19f0   :  { %1539 = vmatmul.mubr.msk.f32.vlgmr.msra.gmra.mrb[10].mxu1 %vm211_vm9, %v1144_v58 }
0x19f3   :  { %v1148_v12 = vpop.permute.xlu1 %1147 }
0x19f7   :  { %v1152_v60 = vpop.permute.xlu1 %1151 }
0x19fe   :  { %v1146_v61 = vpop.permute.xlu0 %1145 }
0x19ff   :  { %1541 = vmatprep.mubr.msk.f32.mxu1 %vm211_vm9, %v1146_v61 }
0x1a00   :  { %1542 = vmatmul.mubr.msk.f32.gmra.mrb[12].mxu1 %vm211_vm9, %v1148_v12 }
0x1a02   :  { %v1150_v54 = vpop.permute.xlu0 %1149 }
0x1a03   :  { %1544 = vmatprep.mubr.msk.f32.mxu1 %vm211_vm9, %v1150_v54 }
0x1a04   :  { %1545 = vmatmul.mubr.msk.f32.gmra.mrb[14].mxu1 %vm211_vm9, %v1152_v60 }
0x1a06   :  { %v1154_v62 = vpop.permute.xlu0 %1153 }
0x1a07   :  { %1547 = vmatprep.mubr.msk.f32.mxu1 %vm211_vm9, %v1154_v62 }
0x1a61   :  { %v1156_v63 = vpop.permute.xlu1 %1155 }
0x1a62   :  { %1548 = vmatmul.mubr.msk.f32.gmra.mrb[16].mxu1 %vm211_vm9, %v1156_v63 }
0x1ac3   :  { %v1540_v5 = vpop.f32.mrb[10].mxu1 }
0x1ac4   :  { %v1245_v7 = vadd.f32 %v1540_v5, %v1132_v3  ;;  %v1239_v11 = vpop.f32.mrb[11].mxu1 }
0x1ac5   :  { %v1240_v9 = vadd.f32 %v1239_v11, %v1132_v3 }
0x1ac6   :  { %1279 = vst [vmem:[%s2087_s2 + $0x8] sm:$0xff] %v1245_v7 }
0x1ac7   :  { %1278 = vst [vmem:[%s2087_s2] sm:$0xff] %v1240_v9 }
0x1ad3   :  { %v1543_v13 = vpop.f32.mrb[12].mxu1 }
0x1ad4   :  { %v1255_v14 = vadd.f32 %v1543_v13, %v1132_v3  ;;  %v1249_v6 = vpop.f32.mrb[13].mxu1 }
0x1ad5   :  { %v1250_v16 = vadd.f32 %v1249_v6, %v1132_v3 }
0x1ad6   :  { %1281 = vst [vmem:[%s2087_s2 + $0x18] sm:$0xff] %v1255_v14 }
0x1ad7   :  { %1280 = vst [vmem:[%s2087_s2 + $0x10] sm:$0xff] %v1250_v16  ;;  %v1546_v34 = vpop.f32.mrb[14].mxu1 }
0x1ad8   :  { %v1265_v39 = vadd.f32 %v1546_v34, %v1132_v3  ;;  %v1259_v17 = vpop.f32.mrb[15].mxu1 }
0x1ad9   :  { %v1260_v18 = vadd.f32 %v1259_v17, %v1132_v3 }
0x1ada   :  { %1283 = vst [vmem:[%s2087_s2 + $0x28] sm:$0xff] %v1265_v39 }
0x1adb   :  { %1282 = vst [vmem:[%s2087_s2 + $0x20] sm:$0xff] %v1260_v18 }
0x1b35   :  { %v1549_v19 = vpop.f32.mrb[16].mxu1 }
0x1b36   :  { %v1275_v20 = vadd.f32 %v1549_v19, %v1132_v3  ;;  %v1269_v33 = vpop.f32.mrb[17].mxu1 }
0x1b37   :  { %v1270_v22 = vadd.f32 %v1269_v33, %v1132_v3 }
0x1b38   :  { %1285 = vst [vmem:[%s2087_s2 + $0x38] sm:$0xff] %v1275_v20 }
0x1b39   :  { %1284 = vst [vmem:[%s2087_s2 + $0x30] sm:$0xff] %v1270_v22 }

</bundles_post_ra>
